<compile_context>
chip_gen: v6e
topology: v6e:2x2x1
jax: 0.10.0
libtpu: 0.0.40
codegen_flags: <defaults>
</compile_context>

<pallas_src>
import math

import jax
import jax.numpy as jnp
import numpy as np
from jax.experimental import pallas as pl
from jax.experimental.pallas import tpu as pltpu

_LANE = 128
_SUBLANE = 8
_MAX_TN = 2048                      # lane-tile cap (multiple of 128)
_MAX_TM = 1024                      # sublane-tile cap

_HW_CACHE = {}


def _round_up(x, m):
    return ((x + m - 1) // m) * m


def _num_tensorcores():
    """TensorCores per chip (1 on v5e/v6e, 2 on v7x).  Safe default: 1."""
    if "cores" in _HW_CACHE:
        return _HW_CACHE["cores"]
    n = 1
    try:
        info = pltpu.get_tpu_info()
        for attr in ("num_cores", "core_count", "num_tensorcores",
                     "tensorcore_count", "cores_per_chip", "num_cores_per_chip"):
            v = getattr(info, attr, None)
            if v is None:
                continue
            try:
                v = int(v)
            except Exception:
                continue
            if v > 0:
                n = v
                break
    except Exception:
        pass
    n = max(1, min(n, 2))           # current gens have 1 or 2 TCs per chip
    _HW_CACHE["cores"] = n
    return n


def _tile_budget():
    """(data-buffer VMEM budget bytes, explicit vmem_limit_bytes or None)."""
    if "budget" in _HW_CACHE:
        return _HW_CACHE["budget"]
    kind = ""
    try:
        kind = jax.devices()[0].device_kind.lower()
    except Exception:
        pass
    if "v6" in kind:
        # v6e: 128 MiB physical VMEM -> bigger tiles amortize per-step overhead.
        budget = (20 << 20, 32 << 20)
    else:
        # Conservative: fits v5e's 16 MiB scoped default and v7x's 64 MiB physical.
        budget = (8 << 20, None)
    _HW_CACHE["budget"] = budget
    return budget


def _sublane_multiple(itemsize):
    # Sub-32-bit dtypes pack rows into sublanes: 8 for f32, 16 for bf16, 32 for int8/fp8.
    return _SUBLANE * max(1, 4 // max(1, itemsize))


def _choose_tiles(M, N, itemsize):
    """Pick a (tm, tn) block for a memory-bound (M, N) row-bias add."""
    vmem_budget, _ = _tile_budget()
    sub = _sublane_multiple(itemsize)
    tn = N if N <= _MAX_TN else _MAX_TN
    lane_row_bytes = _round_up(tn, _LANE) * itemsize
    # VMEM accounting: x-in + out, double-buffered (4 big tiles) + double-buffered
    # (1, tn) bias row (lane-padded).
    bias_bytes = 2 * lane_row_bytes
    avail = max(vmem_budget - bias_bytes, 4 * sub * lane_row_bytes)
    tm = avail // (4 * lane_row_bytes)
    tm = max(sub, (tm // sub) * sub)
    tm = min(tm, _MAX_TM, _round_up(M, sub))
    # Multi-TensorCore chips (v7x): give each core >= 2 pipelined grid steps so DMA-in /
    # VPU add / DMA-out of consecutive steps overlap on both cores.  Single-TC chips
    # (v5e/v6e): never force extra steps (each costs ~0.35 us with zero upside).
    ncores = _num_tensorcores()
    if ncores > 1 and M * N * itemsize >= (1 << 20):
        min_steps = 2 * ncores
        while pl.cdiv(M, tm) * pl.cdiv(N, tn) < min_steps and tm > sub:
            tm = max(sub, _round_up(tm // 2, sub))
    return tm, tn


def _add_bias_kernel(x_ref, b_ref, o_ref):
    # x_ref: (tm, tn); b_ref: (1, tn) periodic bias row, broadcast across sublanes.
    o_ref[...] = x_ref[...] + b_ref[...]


def _add_bias_rows(x2d, bias_row):
    """x2d: (M, N) + bias_row: (1, N) broadcast over rows, tiled Pallas kernel."""
    M, N = x2d.shape
    itemsize = jnp.dtype(x2d.dtype).itemsize
    tm, tn = _choose_tiles(M, N, itemsize)
    grid = (pl.cdiv(M, tm), pl.cdiv(N, tn))
    _, vmem_limit = _tile_budget()
    cp_kwargs = dict(dimension_semantics=("parallel", "parallel"))
    if vmem_limit is not None:
        cp_kwargs["vmem_limit_bytes"] = int(vmem_limit)
    return pl.pallas_call(
        _add_bias_kernel,
        out_shape=jax.ShapeDtypeStruct((M, N), x2d.dtype),
        grid_spec=pltpu.PrefetchScalarGridSpec(
            num_scalar_prefetch=0,
            grid=grid,
            in_specs=[
                pl.BlockSpec((tm, tn), lambda i, j: (i, j)),
                pl.BlockSpec((1, tn), lambda i, j: (0, j)),
            ],
            out_specs=pl.BlockSpec((tm, tn), lambda i, j: (i, j)),
        ),
        compiler_params=pltpu.CompilerParams(**cp_kwargs),
    )(x2d, bias_row)


class AddBiasPallas:
    """JAX/Pallas port of the PyTorch AddBias module (forward pass)."""

    # Below this many elements a Pallas launch is not worth it; plain XLA is already at
    # roofline.  Kept low so the small demo shapes still exercise the kernel; raise
    # (e.g. to 64K) in production.
    _MIN_PALLAS_ELEMS = 1024
    # Max acceptable per-row lane padding when using the natural period-P row layout.
    _MAX_PAD_WASTE = 0.25

    def __init__(self, bias):
        bias = jnp.asarray(bias)
        self._bias = bias.reshape(-1, 1)       # mirrors nn.Parameter(bias.unsqueeze(1))
        self._bias_flat = bias.reshape(-1)
        self._C = int(self._bias_flat.shape[0])
        self._row_cache = {}                   # (repeat, L, dtype) -> (1, L) periodic row

    # -- helpers ------------------------------------------------------------
    def _pattern_row(self, repeat, L, dtype):
        """(1, L) row: bias[c] repeated `repeat` times, tiled to length L (cached)."""
        key = (int(repeat), int(L), jnp.dtype(dtype).str)
        row = self._row_cache.get(key)
        if row is None:
            pat = self._bias_flat.astype(dtype)
            if repeat > 1:
                pat = jnp.repeat(pat, repeat)
            reps = L // (self._C * repeat)
            if reps > 1:
                pat = jnp.tile(pat, reps)
            row = pat.reshape(1, L)
            self._row_cache[key] = row
        return row

    def _jax_add(self, x):
        bshape = (1, self._C) + (1,) * (x.ndim - 2)
        return x + self._bias_flat.astype(x.dtype).reshape(bshape)

    def _apply_periodic(self, x, repeat):
        """x whose flat (row-major) buffer sees a bias pattern of period P = C*repeat."""
        orig_shape = x.shape
        dtype = x.dtype
        P = self._C * repeat
        T = int(x.size)
        if T < self._MIN_PALLAS_ELEMS:
            return self._jax_add(x)

        L0 = P * (_LANE // math.gcd(P, _LANE))      # lcm(P, 128): minimal lane-dense row
        if T % L0 == 0:
            # Fully lane-dense, zero padding: rows of L0, one periodic bias row.
            x2d = x.reshape(T // L0, L0)
            row = self._pattern_row(repeat, L0, dtype)
            return _add_bias_rows(x2d, row).reshape(orig_shape)

        # T is always a multiple of P (= rows * period); the natural (T//P, P) layout only
        # pads the last (<128) lanes of each row.  Accept it when the padding is small
        # (e.g. NCHW spatial 7x7: 784-wide rows -> 12.5% pad instead of 62% lane waste).
        padded = _round_up(P, _LANE)
        if P >= _LANE and (padded - P) / padded <= self._MAX_PAD_WASTE:
            x2d = x.reshape(T // P, P)
            row = self._pattern_row(repeat, P, dtype)
            return _add_bias_rows(x2d, row).reshape(orig_shape)

        # Lane-dense prefix + tiny plain-JAX remainder (remainder < L0 elements).
        T_main = (T // L0) * L0
        if T_main >= max(self._MIN_PALLAS_ELEMS, (3 * T) // 4):
            x_flat = x.reshape(-1)
            row = self._pattern_row(repeat, L0, dtype)
            y_main = _add_bias_rows(x_flat[:T_main].reshape(T_main // L0, L0), row)
            pat = self._pattern_row(repeat, P, dtype)                   # (1, P)
            y_rem = x_flat[T_main:].reshape(-1, P) + pat                # T_main % P == 0
            return jnp.concatenate(
                [y_main.reshape(-1), y_rem.reshape(-1)]).reshape(orig_shape)

        # Small / awkward shapes: plain XLA broadcast add.
        return self._jax_add(x)

    # -- forward ------------------------------------------------------------
    def __call__(self, x):
        x = jnp.asarray(x)
        # Match PyTorch type promotion (e.g. bf16 x + f32 bias -> f32 result).
        out_dtype = jnp.result_type(x.dtype, self._bias_flat.dtype)
        if x.dtype != out_dtype:
            x = x.astype(out_dtype)

        if x.ndim == 1:
            # Tiny vector: plain JAX.
            return x + self._bias_flat.astype(x.dtype)
        if x.ndim == 2:
            assert x.shape[1] == self._C
            return self._apply_periodic(x, repeat=1)
        # >= 3D: bias broadcast over dim 1 (NCHW in the reference module).
        assert x.shape[1] == self._C
        spatial = int(np.prod(x.shape[2:]))
        return self._apply_periodic(x, repeat=spatial)


if __name__ == "__main__":
    key = jax.random.PRNGKey(0)
    keys = jax.random.split(key, 12)

    def ref_nchw(x, b):
        return np.asarray(x) + np.asarray(b).reshape(1, -1, 1, 1)

    def ref_2d(x, b):
        return np.asarray(x) + np.asarray(b).reshape(1, -1)

    # 1) 4D NCHW, canonical small shape -> fully lane-dense repack (P = C*H*W = 1024).
    bias4 = jax.random.normal(keys[0], (4,), jnp.float32)
    m4 = AddBiasPallas(bias4)
    x = jax.random.normal(keys[1], (2, 4, 16, 16), jnp.float32)
    y = jax.block_until_ready(m4(x))
    np.testing.assert_allclose(np.asarray(y), ref_nchw(x, bias4), rtol=1e-6, atol=1e-6)

    # 2) 4D NCHW with spatial 7x7=49 (not a multiple of 128) -> period-row layout.
    bias16 = jax.random.normal(keys[2], (16,), jnp.float32)
    m16 = AddBiasPallas(bias16)
    x = jax.random.normal(keys[3], (2, 16, 7, 7), jnp.float32)
    y = jax.block_until_ready(m16(x))
    np.testing.assert_allclose(np.asarray(y), ref_nchw(x, bias16), rtol=1e-6, atol=1e-6)

    # 3) 2D, lane-aligned feature dim with ragged row count (edge-tile masking).
    bias256 = jax.random.normal(keys[4], (256,), jnp.float32)
    m256 = AddBiasPallas(bias256)
    x = jax.random.normal(keys[5], (1100, 256), jnp.float32)
    y = jax.block_until_ready(m256(x))
    np.testing.assert_allclose(np.asarray(y), ref_2d(x, bias256), rtol=1e-6, atol=1e-6)

    # 4) 2D tiny feature dim, divisible total -> full lane-dense repack (rows of 384).
    bias12 = jax.random.normal(keys[6], (12,), jnp.float32)
    m12 = AddBiasPallas(bias12)
    x = jax.random.normal(keys[7], (512, 12), jnp.float32)
    y = jax.block_until_ready(m12(x))
    np.testing.assert_allclose(np.asarray(y), ref_2d(x, bias12), rtol=1e-6, atol=1e-6)

    # 5) 2D tiny feature dim, non-divisible total -> lane-dense prefix + JAX remainder.
    x = jax.random.normal(keys[8], (100, 12), jnp.float32)
    y = jax.block_until_ready(m12(x))
    np.testing.assert_allclose(np.asarray(y), ref_2d(x, bias12), rtol=1e-6, atol=1e-6)

    # 6) 2D with C=300 (>=128, not a multiple of 128) and odd rows -> period-row layout.
    bias300 = jax.random.normal(keys[9], (300,), jnp.float32)
    m300 = AddBiasPallas(bias300)
    x = jax.random.normal(keys[10], (65, 300), jnp.float32)
    y = jax.block_until_ready(m300(x))
    np.testing.assert_allclose(np.asarray(y), ref_2d(x, bias300), rtol=1e-6, atol=1e-6)

    # 7) bf16 activations + bf16 bias (exercises 16-row sublane-tile rounding).
    bias_b = jax.random.normal(keys[4], (256,), jnp.float32).astype(jnp.bfloat16)
    mb = AddBiasPallas(bias_b)
    xb = jax.random.normal(keys[5], (300, 256), jnp.float32).astype(jnp.bfloat16)
    yb = jax.block_until_ready(mb(xb))
    refb = xb + bias_b.reshape(1, -1)
    np.testing.assert_allclose(np.asarray(yb.astype(jnp.float32)),
                               np.asarray(refb.astype(jnp.float32)),
                               rtol=1e-2, atol=1e-2)

    # 8) Tiny 2D and 1D inputs -> plain-JAX fallback (launch overhead not worth it).
    x = jax.random.normal(keys[1], (2, 4), jnp.float32)
    y = jax.block_until_ready(m4(x))
    np.testing.assert_allclose(np.asarray(y), ref_2d(x, bias4), rtol=1e-6, atol=1e-6)

    x = jax.random.normal(keys[3], (4,), jnp.float32)
    y = jax.block_until_ready(m4(x))
    np.testing.assert_allclose(np.asarray(y), np.asarray(x) + np.asarray(bias4),
                               rtol=1e-6, atol=1e-6)

    print("KERNEL_OK")
</pallas_src>

<mosaic_0001>
module attributes {stable_mosaic.version = 11 : i64} {
  func.func @_add_bias_kernel(%arg0: i32, %arg1: i32, %arg2: memref<8x1024xf32, #tpu.memory_space<vmem>>, %arg3: memref<1x1024xf32, #tpu.memory_space<vmem>>, %arg4: memref<8x1024xf32, #tpu.memory_space<vmem>>) attributes {dimension_semantics = [#tpu.dimension_semantics<parallel>, #tpu.dimension_semantics<parallel>], iteration_bounds = array<i64: 1, 1>, scalar_prefetch = 0 : i64, scratch_operands = 0 : i64, tpu.core_type = #tpu.core_type<tc>, window_params = [{transform_indices = @transform_0, window_bounds = array<i64: 8, 1024>}, {transform_indices = @transform_1, window_bounds = array<i64: 1, 1024>}, {transform_indices = @transform_2, window_bounds = array<i64: 8, 1024>}]} {
    %c0 = arith.constant 0 : index
    %c0_0 = arith.constant 0 : index
    %0 = vector.load %arg2[%c0, %c0_0] : memref<8x1024xf32, #tpu.memory_space<vmem>>, vector<8x1024xf32>
    %c0_1 = arith.constant 0 : index
    %c0_2 = arith.constant 0 : index
    %1 = vector.load %arg3[%c0_1, %c0_2] : memref<1x1024xf32, #tpu.memory_space<vmem>>, vector<1x1024xf32>
    %2 = vector.broadcast %1 : vector<1x1024xf32> to vector<8x1024xf32>
    %3 = arith.addf %0, %2 : vector<8x1024xf32>
    %c0_3 = arith.constant 0 : index
    %c0_4 = arith.constant 0 : index
    %4 = vector.load %arg4[%c0_3, %c0_4] : memref<8x1024xf32, #tpu.memory_space<vmem>>, vector<8x1024xf32>
    tpu.vector_store %arg4[%c0_3, %c0_4], %3 {strides = array<i32>} : memref<8x1024xf32, #tpu.memory_space<vmem>>, vector<8x1024xf32>,
    return
  }
  func.func @transform_0(%arg0: i32, %arg1: i32) -> (i32, i32) {
    %c0_i32 = arith.constant 0 : i32
    return %arg0, %arg1 : i32, i32
  }
  func.func @transform_1(%arg0: i32, %arg1: i32) -> (i32, i32) {
    %c0_i32 = arith.constant 0 : i32
    %c0_i32_0 = arith.constant 0 : i32
    return %c0_i32, %arg1 : i32, i32
  }
  func.func @transform_2(%arg0: i32, %arg1: i32) -> (i32, i32) {
    %c0_i32 = arith.constant 0 : i32
    return %arg0, %arg1 : i32, i32
  }
}

</mosaic_0001>

<bundles_post_ra>
// kernel: tpu_custom_call.1
= control target key start
LH: loop header
LB: loop body
LE: loop exit
PB: predicated region body
PF: predicated region fallthrough
CT: control target
= control target key end

     0   :  { %7 = vsyncpa [#allocation3], 0  ;;  %s302_s0 = inlined_call_operand.hbm [shape: f32[2,1024], index: 0, kind: input, shape index: {}]   ;;  %s303_s1 = inlined_call_operand.hbm [shape: f32[1,1024], index: 1, kind: input, shape index: {}]   ;;  %s304_s2 = inlined_call_operand.hbm [shape: f32[2,1024], index: 2, kind: output, shape index: {}]  }
   0x1   :  { %8 = vsyncpa [#allocation6], 0 }
   0x2   :  { %9 = vsyncpa [#allocation4], 0 }
   0x3   :  { %14 = vsyncadd [#allocation3], 768  ;;  %s266_s9 = smov [#allocation2]  }
   0x4   :  { %s15_s10 = sshll.u32 %s266_s9, 4  ;;  %s16_s10 = int_to_ptr.vmem [resolvable:$true] %s15_s10 }
   0x5   :  { %s208_s11 = scalar_lea.vmem %s16_s10, 256  ;;  %s212_s12 = scalar_lea.vmem %s16_s10, 1024 }
   0x6   :  { %p209_p0 = scmp.ne.s32.totalorder %s16_s10, %s208_s11  ;;  %p213_p1 = scmp.lt.s32.totalorder %s16_s10, %s16_s10 }
   0x7   :  { %p214_p2 = scmp.lt.s32.totalorder %s212_s12, %s208_s11 }
   0x9   :  { %p215_p3 = por %p214_p2, %p213_p1 }
   0xb   :  { %p216_p4 = pnand %p215_p3, %p209_p0 }
   0xd   :  { %219 = shalt.err (!%p216_p4)
}
   0xe   :  { %s267_s13 = smov 256   ;;  %s268_s14 = smov 16  }
   0xf   :  { %21 = dma.hbm_to_vmem [thread:$0]  %s302_s0, 256, %s16_s10, [#allocation3], %s267_s13, %s267_s13, %s268_s14  }
  0x10   :  { %s269_s17 = smov [#allocation5]  }
  0x11   :  { %s28_s18 = sshll.u32 %s269_s17, 4  ;;  %s29_s18 = int_to_ptr.vmem [resolvable:$true] %s28_s18 }
  0x12   :  { %s228_s19 = scalar_lea.vmem %s29_s18, 128  ;;  %p233_p6 = scmp.lt.s32.totalorder %s29_s18, %s29_s18 }
  0x13   :  { %p229_p5 = scmp.ne.s32.totalorder %s29_s18, %s228_s19  ;;  %p234_p7 = scmp.lt.s32.totalorder %s228_s19, %s228_s19 }
  0x15   :  { %p235_p8 = por %p234_p7, %p233_p6 }
  0x17   :  { %p236_p9 = pnand %p235_p8, %p229_p5 }
  0x19   :  { %239 = shalt.err (!%p236_p9)
}
  0x1a   :  { %31 = dma.hbm_to_vmem [thread:$0]  %s303_s1, 128, %s29_s18, [#allocation6]  }
  0x1b   :  { %260 = dma.done.wait [#allocation3], 1024  }
  0x1c   :  { %261 = vsyncadd [#allocation3], 4294966272 }
  0x1d   :  { %262 = dma.done.wait [#allocation6], 128  }
  0x1e   :  { %263 = vsyncadd [#allocation6], 4294967168  ;;  %v48_v0 = vlaneseq  ;;  %v270_v1 = vmov 1983009808   ;;  %v46_v13 = vld [vmem:[#allocation5] sm:$0xff]  ;;  %v39_v34 = vld [vmem:[#allocation2 + $0x8] sm:$0xff] }
  0x1f   :  { %v85_v2 = vunpack.c.l.s4 %v270_v1  ;;  %v38_v31 = vld [vmem:[#allocation2] sm:$0xff]  ;;  %v40_v39 = vld [vmem:[#allocation2 + $0x10] sm:$0xff]  ;;  %v41_v46 = vld [vmem:[#allocation2 + $0x18] sm:$0xff] }
  0x20   :  { %v49_v3 = vshrl.u32 %v48_v0, 7  ;;  %v42_v40 = vld [vmem:[#allocation2 + $0x20] sm:$0xff]  ;;  %v44_v43 = vld [vmem:[#allocation2 + $0x30] sm:$0xff]  ;;  %v43_v48 = vld [vmem:[#allocation2 + $0x28] sm:$0xff] }
  0x21   :  { %v86_v4 = vunpack.c.0.s8 %v85_v2  ;;  %v45_v50 = vld [vmem:[#allocation2 + $0x38] sm:$0xff] }
  0x22   :  { %v50_v5 = vsub.s32 0, %v49_v3  ;;  %v54_v6 = vsub.s32 1, %v49_v3  ;;  %v58_v7 = vsub.s32 2, %v49_v3  ;;  %v62_v8 = vsub.s32 3, %v49_v3 }
  0x23   :  { %v66_v9 = vsub.s32 4, %v49_v3  ;;  %v70_v10 = vsub.s32 5, %v49_v3  ;;  %v74_v11 = vsub.s32 6, %v49_v3  ;;  %v78_v12 = vsub.s32 7, %v49_v3 }
  0x24   :  { %v89_v14 = vsub.s32 %v86_v4, %v49_v3  ;;  %v51_v15 = vrot.slane %v46_v13, %v50_v5  ;;  %v55_v16 = vrot.slane %v46_v13, %v54_v6  ;;  %v59_v17 = vrot.slane %v46_v13, %v58_v7 }
  0x25   :  { %v63_v18 = vrot.slane %v46_v13, %v62_v8  ;;  %v67_v19 = vrot.slane %v46_v13, %v66_v9  ;;  %v71_v20 = vrot.slane %v46_v13, %v70_v10  ;;  %v75_v21 = vrot.slane %v46_v13, %v74_v11 }
  0x26   :  { %v79_v22 = vrot.slane %v46_v13, %v78_v12  ;;  %v80_v23 = vcombine.low %v51_v15, %v55_v16  ;;  %v81_v25 = vcombine.high %v51_v15, %v55_v16 }
  0x27   :  { %v82_v24 = vcombine.low %v59_v17, %v63_v18  ;;  %v83_v26 = vcombine.high %v59_v17, %v63_v18  ;;  %v116_v27 = vcombine.low %v67_v19, %v71_v20  ;;  %v117_v29 = vcombine.high %v67_v19, %v71_v20 }
  0x28   :  { %v118_v28 = vcombine.low %v75_v21, %v79_v22  ;;  %v119_v30 = vcombine.high %v75_v21, %v79_v22  ;;  %v90_v32 = vrot.slane %v80_v23, %v89_v14  ;;  %v97_v35 = vrot.slane %v81_v25, %v89_v14 }
  0x29   :  { %v104_v33 = vrot.slane %v82_v24, %v89_v14  ;;  %v111_v36 = vrot.slane %v83_v26, %v89_v14  ;;  %v126_v37 = vrot.slane %v116_v27, %v89_v14  ;;  %v133_v41 = vrot.slane %v117_v29, %v89_v14 }
  0x2a   :  { %v140_v38 = vrot.slane %v118_v28, %v89_v14  ;;  %v147_v42 = vrot.slane %v119_v30, %v89_v14 }
  0x2b   :  { %v112_v44 = vcombine.low %v90_v32, %v104_v33  ;;  %v113_v45 = vcombine.high %v90_v32, %v104_v33  ;;  %v114_v47 = vcombine.low %v97_v35, %v111_v36  ;;  %v115_v49 = vcombine.high %v97_v35, %v111_v36 }
  0x2c   :  { %v148_v51 = vcombine.low %v126_v37, %v140_v38  ;;  %v149_v52 = vcombine.high %v126_v37, %v140_v38  ;;  %v150_v53 = vcombine.low %v133_v41, %v147_v42  ;;  %v151_v54 = vcombine.high %v133_v41, %v147_v42 }
  0x2d   :  { %v160_v55 = vadd.f32 %v112_v44, %v38_v31  ;;  %v162_v56 = vadd.f32 %v113_v45, %v40_v39  ;;  %v164_v57 = vadd.f32 %v114_v47, %v42_v40  ;;  %v166_v58 = vadd.f32 %v115_v49, %v44_v43 }
  0x2e   :  { %v161_v59 = vadd.f32 %v148_v51, %v39_v34  ;;  %v163_v60 = vadd.f32 %v149_v52, %v41_v46  ;;  %v165_v61 = vadd.f32 %v150_v53, %v43_v48  ;;  %v167_v62 = vadd.f32 %v151_v54, %v45_v50 }
  0x2f   :  { %168 = vst [vmem:[#allocation7] sm:$0xff] %v160_v55  ;;  %170 = vst [vmem:[#allocation7 + $0x10] sm:$0xff] %v162_v56 }
  0x30   :  { %172 = vst [vmem:[#allocation7 + $0x20] sm:$0xff] %v164_v57  ;;  %174 = vst [vmem:[#allocation7 + $0x30] sm:$0xff] %v166_v58 }
  0x31   :  { %169 = vst [vmem:[#allocation7 + $0x8] sm:$0xff] %v161_v59  ;;  %171 = vst [vmem:[#allocation7 + $0x18] sm:$0xff] %v163_v60 }
  0x32   :  { %173 = vst [vmem:[#allocation7 + $0x28] sm:$0xff] %v165_v61  ;;  %175 = vst [vmem:[#allocation7 + $0x38] sm:$0xff] %v167_v62 }
  0x33   :  { %180 = vsyncadd [#allocation4], 768  ;;  %s271_s0 = smov [#allocation7]  }
  0x34   :  { %s181_s1 = sshll.u32 %s271_s0, 4  ;;  %s182_s1 = int_to_ptr.vmem [resolvable:$true] %s181_s1 }
  0x35   :  { %s240_s22 = scalar_lea.vmem %s182_s1, 256  ;;  %s244_s23 = scalar_lea.vmem %s182_s1, 1024 }
  0x36   :  { %p241_p10 = scmp.ne.s32.totalorder %s182_s1, %s240_s22  ;;  %p245_p11 = scmp.lt.s32.totalorder %s182_s1, %s182_s1 }
  0x37   :  { %p246_p12 = scmp.lt.s32.totalorder %s244_s23, %s240_s22 }
  0x39   :  { %p247_p13 = por %p246_p12, %p245_p11 }
  0x3b   :  { %p248_p0 = pnand %p247_p13, %p241_p10 }
  0x3d   :  { %251 = shalt.err (!%p248_p0)
}
  0x3e   :  { %187 = dma.vmem_to_hbm [thread:$0]  %s182_s1, 256, %s304_s2, [#allocation4], %s267_s13, %s267_s13, %s268_s14  }
  0x3f   :  { %264 = dma.done.wait [#allocation4], 1024  }
  0x40   :  { %265 = vsyncadd [#allocation4], 4294966272 }
  0x41   :  { %191 = vsyncpa [#allocation3], 1 }
  0x42   :  { %192 = vsyncpa [#allocation6], 1 }
  0x43   :  { %193 = vsyncpa [#allocation4], 1 }

</bundles_post_ra>
